<compile_context>
chip_gen: v7x
topology: tpu7x:2x2x1
jax: 0.10.0
libtpu: 0.0.40
codegen_flags: <defaults>
</compile_context>

<pallas_src>
import functools

import jax
import jax.numpy as jnp
from jax.experimental import pallas as pl
from jax.experimental.pallas import tpu as pltpu

LEAKY_RELU_SLOPE = 0.3
LN_EPS = 1e-5  # PyTorch nn.LayerNorm default eps

_PACK_ORDER = ("pw1_w", "pw1_b", "dw1_w", "dw1_b", "ln1_g", "ln1_b",
               "pw2_w", "pw2_b", "dw2_w", "dw2_b", "ln2_g", "ln2_b", "lin_w")


def _pack_params(params):
    """Stack all (rows, C) params into one 8-row-aligned buffer; return static offsets."""
    c = params["pw1_w"].shape[1]
    offs, chunks, off = {}, [], 0
    for name in _PACK_ORDER:
        a = params[name].astype(jnp.float32)
        assert a.ndim == 2 and a.shape[1] == c, (name, a.shape)
        offs[name] = off
        rpad = (-a.shape[0]) % 8                      # keep every section sublane-aligned
        if rpad:
            a = jnp.concatenate([a, jnp.zeros((rpad, c), jnp.float32)], axis=0)
        chunks.append(a)
        off += a.shape[0]
    return jnp.concatenate(chunks, axis=0), offs


def _variance_predictor_kernel(
    x_ref, mask_ref, p_ref, lin_b_ref,            # inputs
    out_ref,                                      # output
    pad_ref,                                      # scratch: (BB, T + 2*pad, C) f32
    *, offs, c_in, c, t, bb, kernel_size, slope):
    pad = (kernel_size - 1) // 2
    inv_c = 1.0 / float(c)

    # Zero the halo rows of the shared depthwise scratch once per grid step.
    if pad:
        pad_ref[:, :pad, :] = jnp.zeros((bb, pad, c), jnp.float32)
        pad_ref[:, pad + t:, :] = jnp.zeros((bb, pad, c), jnp.float32)

    def row(name, n=1):
        o = offs[name]
        return p_ref[o:o + n, :]                  # static slice of the packed buffer

    def leaky(v):
        return jnp.where(v >= 0, v, slope * v)

    def layer_norm(v, g_name, b_name):
        # Fused single-pass LN over the channel (lane) axis.
        s = jnp.sum(v, axis=-1, keepdims=True)
        ss = jnp.sum(v * v, axis=-1, keepdims=True)
        mean = s * inv_c
        var = ss * inv_c - mean * mean
        return (v - mean) * jax.lax.rsqrt(var + LN_EPS) * row(g_name) + row(b_name)

    def depthwise(h3, w_name, b_name):
        # 'same' depthwise conv along time via zero-halo scratch + K static slices.
        pad_ref[:, pad:pad + t, :] = h3
        acc = jnp.zeros((bb, t, c), jnp.float32)
        wo = offs[w_name]
        for k in range(kernel_size):              # K is small, static unroll
            acc = acc + pad_ref[:, k:k + t, :] * p_ref[wo + k:wo + k + 1, :]
        return acc + row(b_name)

    x = x_ref[...].astype(jnp.float32)            # (BB, T, C_in)

    # --- ConvTransposed #1: pointwise (1x1) as a flat MXU matmul, then depthwise ---
    h = jnp.dot(x.reshape(bb * t, c_in), row("pw1_w", c_in),
                preferred_element_type=jnp.float32) + row("pw1_b")
    h3 = depthwise(h.reshape(bb, t, c), "dw1_w", "dw1_b")
    h3 = layer_norm(leaky(h3), "ln1_g", "ln1_b")  # Dropout: identity at inference

    # --- ConvTransposed #2 ---
    h = jnp.dot(h3.reshape(bb * t, c), row("pw2_w", c),
                preferred_element_type=jnp.float32) + row("pw2_b")
    h3 = depthwise(h.reshape(bb, t, c), "dw2_w", "dw2_b")
    h3 = layer_norm(leaky(h3), "ln2_g", "ln2_b")

    # --- Linear(C -> 1) + squeeze(-1): lane reduction -> lane-dense (BB, T) output ---
    y = jnp.sum(h3 * row("lin_w"), axis=-1) + lin_b_ref[0]        # (BB, T)

    # --- masked_fill(mask, 0.0) ---
    out_ref[...] = jnp.where(mask_ref[...] != 0, 0.0, y).astype(out_ref.dtype)


def variance_predictor(x, mask, params, *, kernel_size,
                       slope=LEAKY_RELU_SLOPE, batch_block=1):
    """x: (B, T, C_in) f32; mask: (B, T) bool (True = zero out). Returns (B, T) f32."""
    b, t, c_in = x.shape
    c = params["pw1_w"].shape[1]
    assert kernel_size % 2 == 1, "'same' padding=(K-1)//2 assumes odd kernel_size"
    assert b % batch_block == 0, "batch must be divisible by batch_block"
    bb = batch_block
    nb = b // bb
    pad = (kernel_size - 1) // 2

    packed, offs = _pack_params(params)
    lin_b = params["lin_b"].reshape(-1).astype(jnp.float32)       # (1,) -> SMEM scalar
    mask_i = mask.astype(jnp.int32).reshape(nb, bb, t)            # lane-dense mask stream
    packed_shape = packed.shape

    kern = functools.partial(
        _variance_predictor_kernel,
        offs=offs, c_in=c_in, c=c, t=t, bb=bb,
        kernel_size=kernel_size, slope=slope)

    flops = b * t * (2 * c * (c_in + c) + 4 * kernel_size * c + 16 * c)
    bytes_accessed = 4 * (x.size + mask_i.size + b * t + packed.size + 1)

    out = pl.pallas_call(
        kern,
        out_shape=jax.ShapeDtypeStruct((nb, bb, t), jnp.float32),
        grid=(nb,),
        in_specs=[
            pl.BlockSpec((bb, t, c_in), lambda i: (i, 0, 0)),          # activations
            pl.BlockSpec((None, bb, t), lambda i: (i, 0, 0)),          # mask (lane-dense)
            pl.BlockSpec(packed_shape, lambda i: (0, 0)),              # packed params
            pl.BlockSpec(memory_space=pltpu.MemorySpace.SMEM),         # lin_b scalar
        ],
        out_specs=pl.BlockSpec((None, bb, t), lambda i: (i, 0, 0)),    # lane-dense output
        scratch_shapes=[pltpu.VMEM((bb, t + 2 * pad, c), jnp.float32)],
        compiler_params=pltpu.CompilerParams(
            dimension_semantics=("parallel",),        # batches independent -> v7x megacore
            vmem_limit_bytes=32 * 1024 * 1024),
        cost_estimate=pl.CostEstimate(
            flops=int(flops),
            transcendentals=int(2 * b * t),
            bytes_accessed=int(bytes_accessed)),
    )(x, mask_i, packed, lin_b)
    return out.reshape(b, t)


def variance_predictor_ref(x, mask, params, *, kernel_size, slope=LEAKY_RELU_SLOPE):
    """Pure-JAX reference (same math, no Pallas) for a correctness check."""
    pad = (kernel_size - 1) // 2

    def dw(h, w_kc, b_1c):
        hp = jnp.pad(h, ((pad, pad), (0, 0)))
        acc = sum(hp[k:k + h.shape[0], :] * w_kc[k] for k in range(kernel_size))
        return acc + b_1c

    def ln(h, g, bta):
        m = jnp.mean(h, -1, keepdims=True)
        v = jnp.mean(jnp.square(h - m), -1, keepdims=True)
        return (h - m) / jnp.sqrt(v + LN_EPS) * g + bta

    def lrelu(h):
        return jnp.where(h >= 0, h, slope * h)

    def one(xb):
        h = xb @ params["pw1_w"] + params["pw1_b"]
        h = ln(lrelu(dw(h, params["dw1_w"], params["dw1_b"])), params["ln1_g"], params["ln1_b"])
        h = h @ params["pw2_w"] + params["pw2_b"]
        h = ln(lrelu(dw(h, params["dw2_w"], params["dw2_b"])), params["ln2_g"], params["ln2_b"])
        return jnp.sum(h * params["lin_w"], -1) + params["lin_b"][0, 0]

    y = jax.vmap(one)(x)
    return jnp.where(mask, 0.0, y)


if __name__ == "__main__":
    # Small shapes consistent with the module: channels_in=32, channels=32,
    # channels_out=1 (so squeeze(-1) yields (B, T)), kernel_size=5.
    B, T = 2, 16
    C_IN, C, K = 32, 32, 5

    key = jax.random.PRNGKey(0)
    keys = jax.random.split(key, 16)

    def init(k, shape, scale=0.1):
        return scale * jax.random.normal(k, shape, jnp.float32)

    # Parameter layouts (pre-transposed from PyTorch conventions):
    #   pointwise Conv1d weight (C_out, C_in, 1)  -> (C_in, C_out)
    #   depthwise Conv1d weight (C, 1, K)         -> (K, C)
    #   Linear weight (1, C)                      -> (1, C)
    params = {
        "pw1_w": init(keys[0], (C_IN, C)),
        "pw1_b": init(keys[1], (1, C)),
        "dw1_w": init(keys[2], (K, C)),
        "dw1_b": init(keys[3], (1, C)),
        "ln1_g": 1.0 + init(keys[4], (1, C)),
        "ln1_b": init(keys[5], (1, C)),
        "pw2_w": init(keys[6], (C, C)),
        "pw2_b": init(keys[7], (1, C)),
        "dw2_w": init(keys[8], (K, C)),
        "dw2_b": init(keys[9], (1, C)),
        "ln2_g": 1.0 + init(keys[10], (1, C)),
        "ln2_b": init(keys[11], (1, C)),
        "lin_w": init(keys[12], (1, C)),
        "lin_b": init(keys[13], (1, 1)),
    }

    x = jax.random.normal(keys[14], (B, T, C_IN), jnp.float32)
    lengths = jnp.array([T, T - 6], jnp.int32)
    mask = jnp.arange(T)[None, :] >= lengths[:, None]   # True = padded position

    out = variance_predictor(x, mask, params, kernel_size=K, batch_block=1)
    out = jax.block_until_ready(out)

    ref = variance_predictor_ref(x, mask, params, kernel_size=K)
    assert out.shape == (B, T), out.shape
    assert bool(jnp.allclose(out, ref, atol=5e-4, rtol=5e-4)), \
        float(jnp.max(jnp.abs(out - ref)))

    print("KERNEL_OK")
</pallas_src>

<mosaic_0001>
module attributes {stable_mosaic.version = 11 : i64} {
  func.func @_variance_predictor_kernel(%arg0: i32, %arg1: memref<1x16x32xf32, #tpu.memory_space<vmem>>, %arg2: memref<1x1x16xi32, #tpu.memory_space<vmem>>, %arg3: memref<152x32xf32, #tpu.memory_space<vmem>>, %arg4: memref<1xf32, #tpu.memory_space<smem>>, %arg5: memref<1x1x16xf32, #tpu.memory_space<vmem>>, %arg6: memref<1x20x32xf32, #tpu.memory_space<vmem>>) attributes {dimension_semantics = [#tpu.dimension_semantics<parallel>], iteration_bounds = array<i64: 2>, scalar_prefetch = 0 : i64, scratch_operands = 1 : i64, tpu.core_type = #tpu.core_type<tc>, window_params = [{transform_indices = @transform_0, window_bounds = array<i64: 1, 16, 32>}, {transform_indices = @transform_1, window_bounds = array<i64: 1, 1, 16>}, {pipeline_mode = #tpu.pipeline_mode<synchronous>, transform_indices = @transform_2, window_bounds = array<i64: 152, 32>}, {transform_indices = @transform_3, window_bounds = array<i64: 1>}, {transform_indices = @transform_4, window_bounds = array<i64: 1, 1, 16>}]} {
    %cst = arith.constant 0.000000e+00 : f32
    %0 = vector.broadcast %cst : f32 to vector<1x2x32xf32>
    %c0 = arith.constant 0 : index
    %c0_0 = arith.constant 0 : index
    %c0_1 = arith.constant 0 : index
    %1 = vector.load %arg6[%c0, %c0_0, %c0_1] : memref<1x20x32xf32, #tpu.memory_space<vmem>>, vector<1x2x32xf32>
    tpu.vector_store %arg6[%c0, %c0_0, %c0_1], %0 {strides = array<i32>} : memref<1x20x32xf32, #tpu.memory_space<vmem>>, vector<1x2x32xf32>,
    %cst_2 = arith.constant 0.000000e+00 : f32
    %2 = vector.broadcast %cst_2 : f32 to vector<1x2x32xf32>
    %c0_3 = arith.constant 0 : index
    %c18 = arith.constant 18 : index
    %c0_4 = arith.constant 0 : index
    %3 = vector.load %arg6[%c0_3, %c18, %c0_4] : memref<1x20x32xf32, #tpu.memory_space<vmem>>, vector<1x2x32xf32>
    tpu.vector_store %arg6[%c0_3, %c18, %c0_4], %2 {strides = array<i32>} : memref<1x20x32xf32, #tpu.memory_space<vmem>>, vector<1x2x32xf32>,
    %c0_5 = arith.constant 0 : index
    %c0_6 = arith.constant 0 : index
    %c0_7 = arith.constant 0 : index
    %4 = vector.load %arg1[%c0_5, %c0_6, %c0_7] : memref<1x16x32xf32, #tpu.memory_space<vmem>>, vector<1x16x32xf32>
    %5 = vector.shape_cast %4 : vector<1x16x32xf32> to vector<16x32xf32>
    %c0_8 = arith.constant 0 : index
    %c0_9 = arith.constant 0 : index
    %6 = vector.load %arg3[%c0_8, %c0_9] : memref<152x32xf32, #tpu.memory_space<vmem>>, vector<32x32xf32>
    %cst_10 = arith.constant dense<0.000000e+00> : vector<16x32xf32>
    %7 = tpu.matmul %5, %6, %cst_10 {dimension_numbers = #tpu.dot_dimension_numbers<[1], [0], [0], [1], [0, 0, 1, 1], [], []>} : vector<16x32xf32>, vector<32x32xf32>, vector<16x32xf32> -> vector<16x32xf32>
    %c32 = arith.constant 32 : index
    %c0_11 = arith.constant 0 : index
    %8 = vector.load %arg3[%c32, %c0_11] : memref<152x32xf32, #tpu.memory_space<vmem>>, vector<1x32xf32>
    %9 = vector.broadcast %8 : vector<1x32xf32> to vector<16x32xf32>
    %10 = arith.addf %7, %9 : vector<16x32xf32>
    %11 = vector.shape_cast %10 : vector<16x32xf32> to vector<1x16x32xf32>
    %c0_12 = arith.constant 0 : index
    %c2 = arith.constant 2 : index
    %c0_13 = arith.constant 0 : index
    %12 = vector.load %arg6[%c0_12, %c2, %c0_13] : memref<1x20x32xf32, #tpu.memory_space<vmem>>, vector<1x16x32xf32>
    tpu.vector_store %arg6[%c0_12, %c2, %c0_13], %11 {strides = array<i32>} : memref<1x20x32xf32, #tpu.memory_space<vmem>>, vector<1x16x32xf32>,
    %cst_14 = arith.constant 0.000000e+00 : f32
    %13 = vector.broadcast %cst_14 : f32 to vector<1x16x32xf32>
    %c0_15 = arith.constant 0 : index
    %c0_16 = arith.constant 0 : index
    %c0_17 = arith.constant 0 : index
    %14 = vector.load %arg6[%c0_15, %c0_16, %c0_17] : memref<1x20x32xf32, #tpu.memory_space<vmem>>, vector<1x16x32xf32>
    %c40 = arith.constant 40 : index
    %c0_18 = arith.constant 0 : index
    %15 = vector.load %arg3[%c40, %c0_18] : memref<152x32xf32, #tpu.memory_space<vmem>>, vector<1x32xf32>
    %16 = vector.shape_cast %15 : vector<1x32xf32> to vector<1x1x32xf32>
    %17 = vector.broadcast %16 : vector<1x1x32xf32> to vector<1x16x32xf32>
    %18 = arith.mulf %14, %17 : vector<1x16x32xf32>
    %19 = arith.addf %13, %18 : vector<1x16x32xf32>
    %c0_19 = arith.constant 0 : index
    %c1 = arith.constant 1 : index
    %c0_20 = arith.constant 0 : index
    %20 = vector.load %arg6[%c0_19, %c1, %c0_20] : memref<1x20x32xf32, #tpu.memory_space<vmem>>, vector<1x16x32xf32>
    %c41 = arith.constant 41 : index
    %c0_21 = arith.constant 0 : index
    %21 = vector.load %arg3[%c41, %c0_21] : memref<152x32xf32, #tpu.memory_space<vmem>>, vector<1x32xf32>
    %22 = vector.shape_cast %21 : vector<1x32xf32> to vector<1x1x32xf32>
    %23 = vector.broadcast %22 : vector<1x1x32xf32> to vector<1x16x32xf32>
    %24 = arith.mulf %20, %23 : vector<1x16x32xf32>
    %25 = arith.addf %19, %24 : vector<1x16x32xf32>
    %c0_22 = arith.constant 0 : index
    %c2_23 = arith.constant 2 : index
    %c0_24 = arith.constant 0 : index
    %26 = vector.load %arg6[%c0_22, %c2_23, %c0_24] : memref<1x20x32xf32, #tpu.memory_space<vmem>>, vector<1x16x32xf32>
    %c42 = arith.constant 42 : index
    %c0_25 = arith.constant 0 : index
    %27 = vector.load %arg3[%c42, %c0_25] : memref<152x32xf32, #tpu.memory_space<vmem>>, vector<1x32xf32>
    %28 = vector.shape_cast %27 : vector<1x32xf32> to vector<1x1x32xf32>
    %29 = vector.broadcast %28 : vector<1x1x32xf32> to vector<1x16x32xf32>
    %30 = arith.mulf %26, %29 : vector<1x16x32xf32>
    %31 = arith.addf %25, %30 : vector<1x16x32xf32>
    %c0_26 = arith.constant 0 : index
    %c3 = arith.constant 3 : index
    %c0_27 = arith.constant 0 : index
    %32 = vector.load %arg6[%c0_26, %c3, %c0_27] : memref<1x20x32xf32, #tpu.memory_space<vmem>>, vector<1x16x32xf32>
    %c43 = arith.constant 43 : index
    %c0_28 = arith.constant 0 : index
    %33 = vector.load %arg3[%c43, %c0_28] : memref<152x32xf32, #tpu.memory_space<vmem>>, vector<1x32xf32>
    %34 = vector.shape_cast %33 : vector<1x32xf32> to vector<1x1x32xf32>
    %35 = vector.broadcast %34 : vector<1x1x32xf32> to vector<1x16x32xf32>
    %36 = arith.mulf %32, %35 : vector<1x16x32xf32>
    %37 = arith.addf %31, %36 : vector<1x16x32xf32>
    %c0_29 = arith.constant 0 : index
    %c4 = arith.constant 4 : index
    %c0_30 = arith.constant 0 : index
    %38 = vector.load %arg6[%c0_29, %c4, %c0_30] : memref<1x20x32xf32, #tpu.memory_space<vmem>>, vector<1x16x32xf32>
    %c44 = arith.constant 44 : index
    %c0_31 = arith.constant 0 : index
    %39 = vector.load %arg3[%c44, %c0_31] : memref<152x32xf32, #tpu.memory_space<vmem>>, vector<1x32xf32>
    %40 = vector.shape_cast %39 : vector<1x32xf32> to vector<1x1x32xf32>
    %41 = vector.broadcast %40 : vector<1x1x32xf32> to vector<1x16x32xf32>
    %42 = arith.mulf %38, %41 : vector<1x16x32xf32>
    %43 = arith.addf %37, %42 : vector<1x16x32xf32>
    %c48 = arith.constant 48 : index
    %c0_32 = arith.constant 0 : index
    %44 = vector.load %arg3[%c48, %c0_32] : memref<152x32xf32, #tpu.memory_space<vmem>>, vector<1x32xf32>
    %45 = vector.shape_cast %44 : vector<1x32xf32> to vector<1x1x32xf32>
    %46 = vector.broadcast %45 : vector<1x1x32xf32> to vector<1x16x32xf32>
    %47 = arith.addf %43, %46 : vector<1x16x32xf32>
    %cst_33 = arith.constant 0.000000e+00 : f32
    %48 = vector.broadcast %cst_33 : f32 to vector<1x16x32xf32>
    %49 = arith.cmpf oge, %47, %48 : vector<1x16x32xf32>
    %cst_34 = arith.constant 3.000000e-01 : f32
    %50 = vector.broadcast %cst_34 : f32 to vector<1x16x32xf32>
    %51 = arith.mulf %50, %47 : vector<1x16x32xf32>
    %52 = arith.select %49, %47, %51 : vector<1x16x32xi1>, vector<1x16x32xf32>
    %cst_35 = arith.constant dense<0.000000e+00> : vector<1x16xf32>
    %53 = vector.multi_reduction <add>, %52, %cst_35 [2] : vector<1x16x32xf32> to vector<1x16xf32>
    %54 = vector.shape_cast %53 : vector<1x16xf32> to vector<1x16x1xf32>
    %55 = arith.mulf %52, %52 : vector<1x16x32xf32>
    %cst_36 = arith.constant dense<0.000000e+00> : vector<1x16xf32>
    %56 = vector.multi_reduction <add>, %55, %cst_36 [2] : vector<1x16x32xf32> to vector<1x16xf32>
    %57 = vector.shape_cast %56 : vector<1x16xf32> to vector<1x16x1xf32>
    %cst_37 = arith.constant 3.125000e-02 : f32
    %58 = vector.broadcast %cst_37 : f32 to vector<1x16x1xf32>
    %59 = arith.mulf %54, %58 : vector<1x16x1xf32>
    %cst_38 = arith.constant 3.125000e-02 : f32
    %60 = vector.broadcast %cst_38 : f32 to vector<1x16x1xf32>
    %61 = arith.mulf %57, %60 : vector<1x16x1xf32>
    %62 = arith.mulf %59, %59 : vector<1x16x1xf32>
    %63 = arith.subf %61, %62 : vector<1x16x1xf32>
    %64 = vector.broadcast %59 : vector<1x16x1xf32> to vector<1x16x32xf32>
    %65 = arith.subf %52, %64 : vector<1x16x32xf32>
    %cst_39 = arith.constant 9.99999974E-6 : f32
    %66 = vector.broadcast %cst_39 : f32 to vector<1x16x1xf32>
    %67 = arith.addf %63, %66 : vector<1x16x1xf32>
    %68 = math.rsqrt %67 : vector<1x16x1xf32>
    %69 = vector.broadcast %68 : vector<1x16x1xf32> to vector<1x16x32xf32>
    %70 = arith.mulf %65, %69 : vector<1x16x32xf32>
    %c56 = arith.constant 56 : index
    %c0_40 = arith.constant 0 : index
    %71 = vector.load %arg3[%c56, %c0_40] : memref<152x32xf32, #tpu.memory_space<vmem>>, vector<1x32xf32>
    %72 = vector.shape_cast %71 : vector<1x32xf32> to vector<1x1x32xf32>
    %73 = vector.broadcast %72 : vector<1x1x32xf32> to vector<1x16x32xf32>
    %74 = arith.mulf %70, %73 : vector<1x16x32xf32>
    %c64 = arith.constant 64 : index
    %c0_41 = arith.constant 0 : index
    %75 = vector.load %arg3[%c64, %c0_41] : memref<152x32xf32, #tpu.memory_space<vmem>>, vector<1x32xf32>
    %76 = vector.shape_cast %75 : vector<1x32xf32> to vector<1x1x32xf32>
    %77 = vector.broadcast %76 : vector<1x1x32xf32> to vector<1x16x32xf32>
    %78 = arith.addf %74, %77 : vector<1x16x32xf32>
    %79 = vector.shape_cast %78 : vector<1x16x32xf32> to vector<16x32xf32>
    %c72 = arith.constant 72 : index
    %c0_42 = arith.constant 0 : index
    %80 = vector.load %arg3[%c72, %c0_42] : memref<152x32xf32, #tpu.memory_space<vmem>>, vector<32x32xf32>
    %cst_43 = arith.constant dense<0.000000e+00> : vector<16x32xf32>
    %81 = tpu.matmul %79, %80, %cst_43 {dimension_numbers = #tpu.dot_dimension_numbers<[1], [0], [0], [1], [0, 0, 1, 1], [], []>} : vector<16x32xf32>, vector<32x32xf32>, vector<16x32xf32> -> vector<16x32xf32>
    %c104 = arith.constant 104 : index
    %c0_44 = arith.constant 0 : index
    %82 = vector.load %arg3[%c104, %c0_44] : memref<152x32xf32, #tpu.memory_space<vmem>>, vector<1x32xf32>
    %83 = vector.broadcast %82 : vector<1x32xf32> to vector<16x32xf32>
    %84 = arith.addf %81, %83 : vector<16x32xf32>
    %85 = vector.shape_cast %84 : vector<16x32xf32> to vector<1x16x32xf32>
    %c0_45 = arith.constant 0 : index
    %c2_46 = arith.constant 2 : index
    %c0_47 = arith.constant 0 : index
    %86 = vector.load %arg6[%c0_45, %c2_46, %c0_47] : memref<1x20x32xf32, #tpu.memory_space<vmem>>, vector<1x16x32xf32>
    tpu.vector_store %arg6[%c0_45, %c2_46, %c0_47], %85 {strides = array<i32>} : memref<1x20x32xf32, #tpu.memory_space<vmem>>, vector<1x16x32xf32>,
    %cst_48 = arith.constant 0.000000e+00 : f32
    %87 = vector.broadcast %cst_48 : f32 to vector<1x16x32xf32>
    %c0_49 = arith.constant 0 : index
    %c0_50 = arith.constant 0 : index
    %c0_51 = arith.constant 0 : index
    %88 = vector.load %arg6[%c0_49, %c0_50, %c0_51] : memref<1x20x32xf32, #tpu.memory_space<vmem>>, vector<1x16x32xf32>
    %c112 = arith.constant 112 : index
    %c0_52 = arith.constant 0 : index
    %89 = vector.load %arg3[%c112, %c0_52] : memref<152x32xf32, #tpu.memory_space<vmem>>, vector<1x32xf32>
    %90 = vector.shape_cast %89 : vector<1x32xf32> to vector<1x1x32xf32>
    %91 = vector.broadcast %90 : vector<1x1x32xf32> to vector<1x16x32xf32>
    %92 = arith.mulf %88, %91 : vector<1x16x32xf32>
    %93 = arith.addf %87, %92 : vector<1x16x32xf32>
    %c0_53 = arith.constant 0 : index
    %c1_54 = arith.constant 1 : index
    %c0_55 = arith.constant 0 : index
    %94 = vector.load %arg6[%c0_53, %c1_54, %c0_55] : memref<1x20x32xf32, #tpu.memory_space<vmem>>, vector<1x16x32xf32>
    %c113 = arith.constant 113 : index
    %c0_56 = arith.constant 0 : index
    %95 = vector.load %arg3[%c113, %c0_56] : memref<152x32xf32, #tpu.memory_space<vmem>>, vector<1x32xf32>
    %96 = vector.shape_cast %95 : vector<1x32xf32> to vector<1x1x32xf32>
    %97 = vector.broadcast %96 : vector<1x1x32xf32> to vector<1x16x32xf32>
    %98 = arith.mulf %94, %97 : vector<1x16x32xf32>
    %99 = arith.addf %93, %98 : vector<1x16x32xf32>
    %c0_57 = arith.constant 0 : index
    %c2_58 = arith.constant 2 : index
    %c0_59 = arith.constant 0 : index
    %100 = vector.load %arg6[%c0_57, %c2_58, %c0_59] : memref<1x20x32xf32, #tpu.memory_space<vmem>>, vector<1x16x32xf32>
    %c114 = arith.constant 114 : index
    %c0_60 = arith.constant 0 : index
    %101 = vector.load %arg3[%c114, %c0_60] : memref<152x32xf32, #tpu.memory_space<vmem>>, vector<1x32xf32>
    %102 = vector.shape_cast %101 : vector<1x32xf32> to vector<1x1x32xf32>
    %103 = vector.broadcast %102 : vector<1x1x32xf32> to vector<1x16x32xf32>
    %104 = arith.mulf %100, %103 : vector<1x16x32xf32>
    %105 = arith.addf %99, %104 : vector<1x16x32xf32>
    %c0_61 = arith.constant 0 : index
    %c3_62 = arith.constant 3 : index
    %c0_63 = arith.constant 0 : index
    %106 = vector.load %arg6[%c0_61, %c3_62, %c0_63] : memref<1x20x32xf32, #tpu.memory_space<vmem>>, vector<1x16x32xf32>
    %c115 = arith.constant 115 : index
    %c0_64 = arith.constant 0 : index
    %107 = vector.load %arg3[%c115, %c0_64] : memref<152x32xf32, #tpu.memory_space<vmem>>, vector<1x32xf32>
    %108 = vector.shape_cast %107 : vector<1x32xf32> to vector<1x1x32xf32>
    %109 = vector.broadcast %108 : vector<1x1x32xf32> to vector<1x16x32xf32>
    %110 = arith.mulf %106, %109 : vector<1x16x32xf32>
    %111 = arith.addf %105, %110 : vector<1x16x32xf32>
    %c0_65 = arith.constant 0 : index
    %c4_66 = arith.constant 4 : index
    %c0_67 = arith.constant 0 : index
    %112 = vector.load %arg6[%c0_65, %c4_66, %c0_67] : memref<1x20x32xf32, #tpu.memory_space<vmem>>, vector<1x16x32xf32>
    %c116 = arith.constant 116 : index
    %c0_68 = arith.constant 0 : index
    %113 = vector.load %arg3[%c116, %c0_68] : memref<152x32xf32, #tpu.memory_space<vmem>>, vector<1x32xf32>
    %114 = vector.shape_cast %113 : vector<1x32xf32> to vector<1x1x32xf32>
    %115 = vector.broadcast %114 : vector<1x1x32xf32> to vector<1x16x32xf32>
    %116 = arith.mulf %112, %115 : vector<1x16x32xf32>
    %117 = arith.addf %111, %116 : vector<1x16x32xf32>
    %c120 = arith.constant 120 : index
    %c0_69 = arith.constant 0 : index
    %118 = vector.load %arg3[%c120, %c0_69] : memref<152x32xf32, #tpu.memory_space<vmem>>, vector<1x32xf32>
    %119 = vector.shape_cast %118 : vector<1x32xf32> to vector<1x1x32xf32>
    %120 = vector.broadcast %119 : vector<1x1x32xf32> to vector<1x16x32xf32>
    %121 = arith.addf %117, %120 : vector<1x16x32xf32>
    %cst_70 = arith.constant 0.000000e+00 : f32
    %122 = vector.broadcast %cst_70 : f32 to vector<1x16x32xf32>
    %123 = arith.cmpf oge, %121, %122 : vector<1x16x32xf32>
    %cst_71 = arith.constant 3.000000e-01 : f32
    %124 = vector.broadcast %cst_71 : f32 to vector<1x16x32xf32>
    %125 = arith.mulf %124, %121 : vector<1x16x32xf32>
    %126 = arith.select %123, %121, %125 : vector<1x16x32xi1>, vector<1x16x32xf32>
    %cst_72 = arith.constant dense<0.000000e+00> : vector<1x16xf32>
    %127 = vector.multi_reduction <add>, %126, %cst_72 [2] : vector<1x16x32xf32> to vector<1x16xf32>
    %128 = vector.shape_cast %127 : vector<1x16xf32> to vector<1x16x1xf32>
    %129 = arith.mulf %126, %126 : vector<1x16x32xf32>
    %cst_73 = arith.constant dense<0.000000e+00> : vector<1x16xf32>
    %130 = vector.multi_reduction <add>, %129, %cst_73 [2] : vector<1x16x32xf32> to vector<1x16xf32>
    %131 = vector.shape_cast %130 : vector<1x16xf32> to vector<1x16x1xf32>
    %cst_74 = arith.constant 3.125000e-02 : f32
    %132 = vector.broadcast %cst_74 : f32 to vector<1x16x1xf32>
    %133 = arith.mulf %128, %132 : vector<1x16x1xf32>
    %cst_75 = arith.constant 3.125000e-02 : f32
    %134 = vector.broadcast %cst_75 : f32 to vector<1x16x1xf32>
    %135 = arith.mulf %131, %134 : vector<1x16x1xf32>
    %136 = arith.mulf %133, %133 : vector<1x16x1xf32>
    %137 = arith.subf %135, %136 : vector<1x16x1xf32>
    %138 = vector.broadcast %133 : vector<1x16x1xf32> to vector<1x16x32xf32>
    %139 = arith.subf %126, %138 : vector<1x16x32xf32>
    %cst_76 = arith.constant 9.99999974E-6 : f32
    %140 = vector.broadcast %cst_76 : f32 to vector<1x16x1xf32>
    %141 = arith.addf %137, %140 : vector<1x16x1xf32>
    %142 = math.rsqrt %141 : vector<1x16x1xf32>
    %143 = vector.broadcast %142 : vector<1x16x1xf32> to vector<1x16x32xf32>
    %144 = arith.mulf %139, %143 : vector<1x16x32xf32>
    %c128 = arith.constant 128 : index
    %c0_77 = arith.constant 0 : index
    %145 = vector.load %arg3[%c128, %c0_77] : memref<152x32xf32, #tpu.memory_space<vmem>>, vector<1x32xf32>
    %146 = vector.shape_cast %145 : vector<1x32xf32> to vector<1x1x32xf32>
    %147 = vector.broadcast %146 : vector<1x1x32xf32> to vector<1x16x32xf32>
    %148 = arith.mulf %144, %147 : vector<1x16x32xf32>
    %c136 = arith.constant 136 : index
    %c0_78 = arith.constant 0 : index
    %149 = vector.load %arg3[%c136, %c0_78] : memref<152x32xf32, #tpu.memory_space<vmem>>, vector<1x32xf32>
    %150 = vector.shape_cast %149 : vector<1x32xf32> to vector<1x1x32xf32>
    %151 = vector.broadcast %150 : vector<1x1x32xf32> to vector<1x16x32xf32>
    %152 = arith.addf %148, %151 : vector<1x16x32xf32>
    %c144 = arith.constant 144 : index
    %c0_79 = arith.constant 0 : index
    %153 = vector.load %arg3[%c144, %c0_79] : memref<152x32xf32, #tpu.memory_space<vmem>>, vector<1x32xf32>
    %154 = vector.shape_cast %153 : vector<1x32xf32> to vector<1x1x32xf32>
    %155 = vector.broadcast %154 : vector<1x1x32xf32> to vector<1x16x32xf32>
    %156 = arith.mulf %152, %155 : vector<1x16x32xf32>
    %cst_80 = arith.constant dense<0.000000e+00> : vector<1x16xf32>
    %157 = vector.multi_reduction <add>, %156, %cst_80 [2] : vector<1x16x32xf32> to vector<1x16xf32>
    %c0_81 = arith.constant 0 : index
    %158 = memref.load %arg4[%c0_81] : memref<1xf32, #tpu.memory_space<smem>>
    %159 = vector.broadcast %158 : f32 to vector<1x16xf32>
    %160 = arith.addf %157, %159 : vector<1x16xf32>
    %c0_82 = arith.constant 0 : index
    %c0_83 = arith.constant 0 : index
    %c0_84 = arith.constant 0 : index
    %161 = vector.load %arg2[%c0_82, %c0_83, %c0_84] : memref<1x1x16xi32, #tpu.memory_space<vmem>>, vector<1x1x16xi32>
    %162 = vector.shape_cast %161 : vector<1x1x16xi32> to vector<1x16xi32>
    %c0_i32 = arith.constant 0 : i32
    %163 = vector.broadcast %c0_i32 : i32 to vector<1x16xi32>
    %164 = arith.cmpi ne, %162, %163 : vector<1x16xi32>
    %cst_85 = arith.constant 0.000000e+00 : f32
    %165 = vector.broadcast %cst_85 : f32 to vector<1x16xf32>
    %166 = arith.select %164, %165, %160 : vector<1x16xi1>, vector<1x16xf32>
    %c0_86 = arith.constant 0 : index
    %c0_87 = arith.constant 0 : index
    %c0_88 = arith.constant 0 : index
    %167 = vector.load %arg5[%c0_86, %c0_87, %c0_88] : memref<1x1x16xf32, #tpu.memory_space<vmem>>, vector<1x1x16xf32>
    %168 = vector.shape_cast %167 : vector<1x1x16xf32> to vector<1x16xf32>
    %169 = vector.shape_cast %166 : vector<1x16xf32> to vector<1x1x16xf32>
    tpu.vector_store %arg5[%c0_86, %c0_87, %c0_88], %169 {strides = array<i32>} : memref<1x1x16xf32, #tpu.memory_space<vmem>>, vector<1x1x16xf32>,
    return
  }
  func.func @transform_0(%arg0: i32) -> (i32, i32, i32) {
    %c0_i32 = arith.constant 0 : i32
    %c0_i32_0 = arith.constant 0 : i32
    %c0_i32_1 = arith.constant 0 : i32
    return %arg0, %c0_i32, %c0_i32_0 : i32, i32, i32
  }
  func.func @transform_1(%arg0: i32) -> (i32, i32, i32) {
    %c0_i32 = arith.constant 0 : i32
    %c0_i32_0 = arith.constant 0 : i32
    %c0_i32_1 = arith.constant 0 : i32
    return %arg0, %c0_i32, %c0_i32_0 : i32, i32, i32
  }
  func.func @transform_2(%arg0: i32) -> (i32, i32) {
    %c0_i32 = arith.constant 0 : i32
    %c0_i32_0 = arith.constant 0 : i32
    %c0_i32_1 = arith.constant 0 : i32
    return %c0_i32, %c0_i32_0 : i32, i32
  }
  func.func @transform_3(%arg0: i32) -> i32 {
    %c0_i32 = arith.constant 0 : i32
    %c0_i32_0 = arith.constant 0 : i32
    return %c0_i32 : i32
  }
  func.func @transform_4(%arg0: i32) -> (i32, i32, i32) {
    %c0_i32 = arith.constant 0 : i32
    %c0_i32_0 = arith.constant 0 : i32
    %c0_i32_1 = arith.constant 0 : i32
    return %arg0, %c0_i32, %c0_i32_0 : i32, i32, i32
  }
}

</mosaic_0001>

<bundles_post_ra>
// kernel: tpu_custom_call.1
= control target key start
LH: loop header
LB: loop body
LE: loop exit
PB: predicated region body
PF: predicated region fallthrough
CT: control target
= control target key end

     0   :  { %s1387_s0 = inlined_call_operand.vmem [shape: f32[2,16,32], index: 0, kind: input, shape index: {}]   ;;  %s1388_s1 = inlined_call_operand.vmem [shape: s32[2,1,16], index: 1, kind: input, shape index: {}]   ;;  %s1389_s2 = inlined_call_operand.vmem [shape: f32[152,32], index: 2, kind: input, shape index: {}]   ;;  %s1390_s3 = inlined_call_operand.<no memory space> [shape: f32[1], index: 3, kind: input, shape index: {}]   ;;  %s1391_s4 = inlined_call_operand.hbm [shape: f32[2,1,16], index: 4, kind: output, shape index: {}]  }
   0x1   :  { %9 = sst [smem:[#allocation3]] %s1390_s3 }
   0x2   :  { %10 = vsyncpa [#allocation5], 0 }
   0x3   :  { %12 = vsyncpa [#allocation5 + $0x1], 0  ;;  %s1152_s17 = smov 0   ;;  %s1154_s18 = smov 0  }
   0x4   :  { %s1156_s19 = smov 0   ;;  %s1158_s20 = smov 0  }
   0x5 LB: > { %s1173_s3 = sadd.s32 4294967295, %s1118_s20   ;;  %s921_s21 = sadd.s32 4294967294, %s1118_s20   ;;  %s1118_s20 = sphi %s1158_s20, %s1397_s20   ;;  %s1114_s19 = sphi %s1156_s19, %s1396_s19   ;;  %s1110_s18 = sphi %s1154_s18, %s1395_s18   ;;  %s1106_s17 = sphi %s1152_s17, %s1394_s17  }
   0x6   : > { %s1177_s22 = sadd.s32 1, %s1118_s20   ;;  %s119_s23 = sadd.s32 1, %s1114_s19 }
   0x7   : > { %s116_s24 = ssub.s32 %s1118_s20, %s1177_s22  ;;  %p129_p0 = scmp.ne.s32.totalorder %s1114_s19, %s1110_s18 }
   0x8   : > { %p117_p1 = scmp.eq.s32.totalorder %s116_s24, 0  ;;  %p130_p2 = scmp.eq.s32.totalorder %s1173_s3, 1 }
   0x9   : > { %p135_p3 = scmp.ne.s32.totalorder %s1110_s18, %s1106_s17  ;;  %p136_p4 = scmp.eq.s32.totalorder %s921_s21, 1 }
   0xa   : > { %s1188_s25 = scalar_select %p117_p1, %s1114_s19, %s119_s23  }
   0xb   : > { %p1190_p5 = por %p130_p2, %p129_p0  ;;  %p1194_p6 = por %p136_p4, %p135_p3 }
   0xc   : > { %p924_p7 = scmp.ge.s32.totalorder %s1118_s20, 1  ;;  %p174_p8 = scmp.lt.s32.totalorder %s1118_s20, 3 }
   0xe   : > { %p175_p9 = pnand %p924_p7, %p174_p8 }
   0xf   : > { %v215_v0 = vld [vmem:[%s1389_s2] sm:$0xff] (!%p175_p9)  ;;  %v216_v1 = vld [vmem:[%s1389_s2 + $0x8] sm:$0xff] (!%p175_p9)  ;;  %v217_v2 = vld [vmem:[%s1389_s2 + $0x10] sm:$0xff] (!%p175_p9)  ;;  %p202_p10 = scmp.lt.s32.totalorder (!%p175_p9), %s1173_s3, 1  ;;  %vm224_vm0 = vcmask (!%p175_p9), 261120   ;;  %vm210_vm1 = vcmask (!%p175_p9), 254976  }
  0x10   : > { %178 = sbr.rel (%p175_p9) target bundleno = 1163 (0x48b), region = 36  ;;  %v988_v3 = vpack.c.bf16 (!%p175_p9), %v216_v1, %v215_v0  ;;  %v218_v4 = vld [vmem:[%s1389_s2 + $0x18] sm:$0xff] (!%p175_p9)  ;;  %v1120_v8 = vmov (!%p175_p9), 0.0   ;;  %v927_v9 = vld [vmem:[%s1389_s2 + $0x20] ss:$0 sm:$0xff] (!%p175_p9)  ;;  %v420_v60 = vld [vmem:[%s1389_s2 + $0x48] sm:$0xff] (!%p175_p9) }
  0x11   : > { %v992_v5 = vpack.c.bf16 (!%p175_p9), %v218_v4, %v217_v2  ;;  %211 = vst.msk [vmem:[#allocation2] sm:$0x3] (!%p175_p9), %vm210_vm1, %v1120_v8  ;;  %212 = vst.msk [vmem:[#allocation2 + $0x12] sm:$0x3] (!%p175_p9), %vm210_vm1, %v1120_v8  ;;  %v930_v14 = vld [vmem:[%s1389_s2 + $0x28] ss:$0 sm:$0xff] (!%p175_p9) }
  0x12   : > { %989 = vmatprep.subr.bf16.mxu0 (!%p175_p9), %v988_v3  ;;  %v931_v15 = vld [vmem:[%s1389_s2 + $0x29] ss:$0 sm:$0xff] (!%p175_p9)  ;;  %v932_v16 = vld [vmem:[%s1389_s2 + $0x2a] ss:$0 sm:$0xff] (!%p175_p9)  ;;  %v933_v22 = vld [vmem:[%s1389_s2 + $0x2b] ss:$0 sm:$0xff] (!%p175_p9) }
  0x13   : > { %991 = vmatpush3.bf16.msra.mxu0 (!%p175_p9), %v988_v3  ;;  %v934_v32 = vld [vmem:[%s1389_s2 + $0x2c] ss:$0 sm:$0xff] (!%p175_p9)  ;;  %v935_v43 = vld [vmem:[%s1389_s2 + $0x30] ss:$0 sm:$0xff] (!%p175_p9)  ;;  %v422_v62 = vld [vmem:[%s1389_s2 + $0x58] sm:$0xff] (!%p175_p9)  ;;  %s637_s9 = sld [smem:[#allocation3]] (!%p175_p9) }
  0x14   : > { %993 = vmatprep.subr.bf16.mxu0 (!%p175_p9), %v992_v5  ;;  %v421_v61 = vld [vmem:[%s1389_s2 + $0x50] sm:$0xff] (!%p175_p9)  ;;  %v423_v0 = vld [vmem:[%s1389_s2 + $0x60] sm:$0xff] (!%p175_p9)  ;;  %vm824_vm6 = vcmask (!%p175_p9), 130112   ;;  %s950_s15 = sshll.u32 (!%p175_p9), %s1173_s3, 4  ;;  %vm842_vm8 = vcmask (!%p175_p9), 122880   ;;  %s1123_s29 = smov (!%p175_p9), [#allocation4]  }
  0x15   : > { %v996_v63 = vpack.c.bf16 (!%p175_p9), %v421_v61, %v420_v60  ;;  %v1000_v1 = vpack.c.bf16 (!%p175_p9), %v423_v0, %v422_v62  ;;  %v946_v62 = vld [vmem:[%s1389_s2 + $0x78] ss:$0 sm:$0xff] (!%p175_p9)  ;;  %s1060_s30 = sshll.u32 (!%p175_p9), %s1123_s29, 4  ;;  %s1061_s30 = int_to_ptr.vmem [resolvable:$false] %s1060_s30 }
  0x16   : > { %s1062_s5 = scalar_lea.vmem (!%p175_p9), %s1061_s30, 32 }
  0x17   : > { %s1214_s10 = scalar_select %p202_p10, %s1173_s3, 1  ;;  %995 = vmatpush3.bf16.msra.mxu0 %v992_v5  ;;  %997 = vmatprep.subr.bf16.mxu1 %v996_v63 }
  0x18   : > { %999 = vmatpush3.bf16.msra.mxu1 %v996_v63 }
  0x19   : > { %s953_s11 = sshll.u32 %s1214_s10, 4  ;;  %1001 = vmatprep.subr.bf16.mxu1 %v1000_v1 }
  0x1a   : > { %s206_s14 = scalar_lea.vmem %s1387_s0, %s953_s11  ;;  %s200_s11 = sand.u32 1, %s1110_s18  }
  0x1b   : > { %v213_v6 = vld [vmem:[%s206_s14] sm:$0xff]  ;;  %v214_v7 = vld [vmem:[%s206_s14 + $0x8] sm:$0xff]  ;;  %s209_s14 = scalar_lea.vmem %s1388_s1, %s1214_s10  ;;  %s201_s16 = scalar_lea.vmem [#allocation4], %s200_s11 }
  0x1c   : > { %974 = vmatprep.mubr.msk.f32.mxu0 %vm224_vm0, %v213_v6  ;;  %1003 = vmatpush3.bf16.msra.mxu1 %v1000_v1  ;;  %s857_s21 = sshll.u32 %s201_s16, 4  ;;  %s1345_s10 = scalar_lea.hbm %s1391_s4, %s950_s15  ;;  %s1347_s21 = int_to_ptr.vmem [resolvable:$true] %s857_s21 }
  0x1d   : > { %975 = vmatmul.mubr.msk.f32.vlgmr.msra.gmra.mrb[0].mxu0 %vm224_vm0, %v214_v7  ;;  %s845_s28 = scalar_lea.sflag [#allocation5], %s200_s11  ;;  %s1056_s3 = scalar_lea.vmem %s1347_s21, 16 }
  0x1e   : > { %p1057_p11 = scmp.ne.s32.totalorder %s1347_s21, %s1056_s3  ;;  %p1063_p0 = scmp.lt.s32.totalorder %s1347_s21, %s1061_s30 }
  0x1f   : > { %p1064_p1 = scmp.lt.s32.totalorder %s1062_s5, %s1056_s3 }
  0x20   : > { %p1058_p12 = pnand %p1057_p11, %p1190_p5 }
  0x21   : > { %p1065_p2 = por %p1064_p1, %p1063_p0 }
  0x22   : > { %p1059_p13 = pneg %p1058_p12 }
  0x24   : > { %p1066_p3 = pnand %p1065_p2, %p1059_p13 }
  0xf0   : > { %v976_v10 = vpop.f32.mrb[0].mxu0 }
  0xf1   : > { %v303_v11 = vadd.f32 %v976_v10, %v927_v9  ;;  %v297_v12 = vpop.f32.mrb[1].mxu0 }
  0xf2   : > { %v298_v13 = vadd.f32 %v927_v9, %v297_v12 }
  0xf3   : > { %307 = vst.msk [vmem:[#allocation2 + $0xa] sm:$0xff] %vm224_vm0, %v303_v11 }
  0xf4   : > { %306 = vst.msk [vmem:[#allocation2 + $0x2] sm:$0xff] %vm224_vm0, %v298_v13 }
  0xfa   : > { %v331_v27 = vld [vmem:[#allocation2 + $0xa] sm:$0xff] }
  0xfb   : > { %v308_v17 = vld [vmem:[#allocation2] sm:$0xff]  ;;  %v309_v23 = vld [vmem:[#allocation2 + $0x8] sm:$0xff]  ;;  %v338_v37 = vmul.f32 %v932_v16, %v331_v27 }
  0xfc   : > { %v319_v18 = vld [vmem:[#allocation2 + $0x1] sm:$0xff]  ;;  %v315_v20 = vmul.f32 %v930_v14, %v308_v17  ;;  %v316_v25 = vmul.f32 %v930_v14, %v309_v23  ;;  %v320_v26 = vld [vmem:[#allocation2 + $0x9] sm:$0xff] }
  0xfd   : > { %v330_v19 = vld [vmem:[#allocation2 + $0x2] sm:$0xff]  ;;  %v326_v21 = vmul.f32 %v931_v15, %v319_v18  ;;  %v327_v30 = vmul.f32 %v931_v15, %v320_v26  ;;  %v342_v33 = vld [vmem:[#allocation2 + $0xb] sm:$0xff]  ;;  %v936_v18 = vld [vmem:[%s1389_s2 + $0x38] ss:$0 sm:$0xff] }
  0xfe   : > { %v341_v24 = vld [vmem:[#allocation2 + $0x3] sm:$0xff]  ;;  %v337_v29 = vmul.f32 %v932_v16, %v330_v19  ;;  %v353_v38 = vld [vmem:[#allocation2 + $0xc] sm:$0xff]  ;;  %v349_v42 = vmul.f32 %v933_v22, %v342_v33 }
  0xff   : > { %v328_v28 = vadd.f32 %v326_v21, %v315_v20  ;;  %v352_v31 = vld [vmem:[#allocation2 + $0x4] sm:$0xff]  ;;  %v348_v35 = vmul.f32 %v933_v22, %v341_v24  ;;  %v329_v36 = vadd.f32 %v327_v30, %v316_v25  ;;  %v360_v46 = vmul.f32 %v934_v32, %v353_v38  ;;  %v937_v20 = vld [vmem:[%s1389_s2 + $0x40] ss:$0 sm:$0xff]  ;;  %v941_v33 = vld [vmem:[%s1389_s2 + $0x70] ss:$0 sm:$0xff] }
 0x100   : > { %v359_v40 = vmul.f32 %v934_v32, %v352_v31 }
 0x101   : > { %v339_v34 = vadd.f32 %v337_v29, %v328_v28  ;;  %v340_v41 = vadd.f32 %v338_v37, %v329_v36  ;;  %v938_v28 = vld [vmem:[%s1389_s2 + $0x68] ss:$0 sm:$0xff]  ;;  %v943_v36 = vld [vmem:[%s1389_s2 + $0x72] ss:$0 sm:$0xff] }
 0x103   : > { %v350_v39 = vadd.f32 %v348_v35, %v339_v34  ;;  %v351_v45 = vadd.f32 %v349_v42, %v340_v41  ;;  %v942_v34 = vld [vmem:[%s1389_s2 + $0x71] ss:$0 sm:$0xff] }
 0x105   : > { %v361_v44 = vadd.f32 %v359_v40, %v350_v39  ;;  %v362_v48 = vadd.f32 %v360_v46, %v351_v45  ;;  %v944_v46 = vld [vmem:[%s1389_s2 + $0x73] ss:$0 sm:$0xff] }
 0x107   : > { %v368_v47 = vadd.f32 %v935_v43, %v361_v44  ;;  %v369_v50 = vadd.f32 %v935_v43, %v362_v48 }
 0x109   : > { %vm370_vm2 = vcmp.ge.f32.partialorder %v368_v47, 0.0  ;;  %v372_v49 = vmul.f32 0.3, %v368_v47  ;;  %vm371_vm3 = vcmp.ge.f32.partialorder %v369_v50, 0.0  ;;  %v373_v52 = vmul.f32 0.3, %v369_v50 }
 0x10b   : > { %v374_v51 = vsel %vm370_vm2, %v368_v47, %v372_v49  ;;  %v375_v55 = vsel %vm371_vm3, %v369_v50, %v373_v52  ;;  %v945_v52 = vld [vmem:[%s1389_s2 + $0x74] ss:$0 sm:$0xff] }
 0x10c   : > { %v376_v53 = vsel %vm224_vm0, %v374_v51, 0.0  ;;  %v382_v54 = vmul.f32 %v374_v51, %v374_v51  ;;  %v383_v57 = vmul.f32 %v375_v55, %v375_v55  ;;  %v379_v58 = vsel %vm224_vm0, %v375_v55, 0.0 }
 0x10d   : > { %377 = vadd.xlane.f32.xlu0 %v376_v53 }
 0x10e   : > { %v384_v56 = vsel %vm224_vm0, %v382_v54, 0.0  ;;  %v387_v59 = vsel %vm224_vm0, %v383_v57, 0.0 }
 0x10f   : > { %385 = vadd.xlane.f32.xlu1 %v384_v56 }
 0x111   : > { %380 = vadd.xlane.f32.xlu0 %v379_v58 }
 0x113   : > { %388 = vadd.xlane.f32.xlu1 %v387_v59 }
 0x19a   : > { %v378_v2 = vpop.xlane.xlu0 %377 }
 0x19b   : > { %v390_v3 = vmul.f32 0.03125, %v378_v2 }
 0x19c   : > { %v386_v4 = vpop.xlane.xlu1 %385 }
 0x19d   : > { %v394_v5 = vmul.f32 %v390_v3, %v390_v3  ;;  %v392_v6 = vmul.f32 0.03125, %v386_v4  ;;  %v398_v16 = vsub.f32 %v374_v51, %v390_v3 }
 0x19e   : > { %v381_v7 = vpop.xlane.xlu0 %380 }
 0x19f   : > { %v396_v8 = vsub.f32 %v392_v6, %v394_v5  ;;  %v391_v9 = vmul.f32 0.03125, %v381_v7 }
 0x1a0   : > { %v389_v10 = vpop.xlane.xlu1 %388 }
 0x1a1   : > { %v400_v11 = vadd.f32 1e-05, %v396_v8  ;;  %v395_v12 = vmul.f32 %v391_v9, %v391_v9  ;;  %v393_v13 = vmul.f32 0.03125, %v389_v10  ;;  %v399_v21 = vsub.f32 %v375_v55, %v391_v9 }
 0x1a3   : > { %1048 = vrsqrt.f32 %v400_v11  ;;  %v397_v14 = vsub.f32 %v393_v13, %v395_v12 }
 0x1a5   : > { %v401_v15 = vadd.f32 1e-05, %v397_v14 }
 0x1a7   : > { %1050 = vrsqrt.f32 %v401_v15 }
 0x1ad   : > { %v1049_v17 = vpop.eup %1048 }
 0x1ae   : > { %v404_v19 = vmul.f32 %v1049_v17, %v398_v16 }
 0x1b0   : > { %v411_v22 = vmul.f32 %v936_v18, %v404_v19 }
 0x1b1   : > { %v1051_v23 = vpop.eup %1050 }
 0x1b2   : > { %v405_v24 = vmul.f32 %v1051_v23, %v399_v21  ;;  %v418_v25 = vadd.f32 %v937_v20, %v411_v22 }
 0x1b4   : > { %v412_v26 = vmul.f32 %v936_v18, %v405_v24  ;;  %985 = vmatprep.mubr.msk.f32.mxu1 %vm224_vm0, %v418_v25 }
 0x1b6   : > { %v419_v27 = vadd.f32 %v937_v20, %v412_v26 }
 0x1b8   : > { %986 = vmatmul.mubr.msk.f32.vlgmr.msra.gmra.mrb[0].mxu1 %vm224_vm0, %v419_v27 }
 0x28b   : > { %v987_v29 = vpop.f32.mrb[0].mxu1 }
 0x28c   : > { %v507_v30 = vadd.f32 %v987_v29, %v938_v28  ;;  %v501_v31 = vpop.f32.mrb[1].mxu1 }
 0x28d   : > { %v502_v32 = vadd.f32 %v938_v28, %v501_v31 }
 0x28e   : > { %511 = vst.msk [vmem:[#allocation2 + $0xa] sm:$0xff] %vm224_vm0, %v507_v30 }
 0x28f   : > { %510 = vst.msk [vmem:[#allocation2 + $0x2] sm:$0xff] %vm224_vm0, %v502_v32  ;;  %v947_v32 = vld [vmem:[%s1389_s2 + $0x80] ss:$0 sm:$0xff] }
 0x295   : > { %v535_v35 = vld [vmem:[#allocation2 + $0xa] sm:$0xff] }
 0x296   : > { %v513_v37 = vld [vmem:[#allocation2 + $0x8] sm:$0xff]  ;;  %v512_v39 = vld [vmem:[#allocation2] sm:$0xff]  ;;  %v542_v49 = vmul.f32 %v943_v36, %v535_v35 }
 0x297   : > { %v524_v38 = vld [vmem:[#allocation2 + $0x9] sm:$0xff]  ;;  %v520_v40 = vmul.f32 %v941_v33, %v513_v37  ;;  %v519_v42 = vmul.f32 %v941_v33, %v512_v39  ;;  %v523_v43 = vld [vmem:[#allocation2 + $0x1] sm:$0xff] }
 0x298   : > { %v531_v41 = vmul.f32 %v942_v34, %v524_v38  ;;  %v534_v44 = vld [vmem:[#allocation2 + $0x2] sm:$0xff]  ;;  %v546_v45 = vld [vmem:[#allocation2 + $0xb] sm:$0xff]  ;;  %v530_v47 = vmul.f32 %v942_v34, %v523_v43 }
 0x299   : > { %v545_v50 = vld [vmem:[#allocation2 + $0x3] sm:$0xff]  ;;  %v557_v51 = vld [vmem:[#allocation2 + $0xc] sm:$0xff]  ;;  %v541_v54 = vmul.f32 %v943_v36, %v534_v44  ;;  %v553_v56 = vmul.f32 %v944_v46, %v546_v45 }
 0x29a   : > { %v533_v48 = vadd.f32 %v531_v41, %v520_v40  ;;  %v532_v53 = vadd.f32 %v530_v47, %v519_v42  ;;  %v556_v57 = vld [vmem:[#allocation2 + $0x4] sm:$0xff]  ;;  %v552_v59 = vmul.f32 %v944_v46, %v545_v50  ;;  %v564_v61 = vmul.f32 %v945_v52, %v557_v51  ;;  %v949_v38 = vld [vmem:[%s1389_s2 + $0x90] ss:$0 sm:$0xff] }
 0x29b   : > { %v563_v0 = vmul.f32 %v945_v52, %v556_v57  ;;  %v948_v35 = vld [vmem:[%s1389_s2 + $0x88] ss:$0 sm:$0xff]  ;;  %v1121_v46 = vmov 0   ;;  %v645_v47 = vlaneseq  ;;  %v638_v51 = vstv %s637_s9 }
 0x29c   : > { %v544_v55 = vadd.f32 %v542_v49, %v533_v48  ;;  %v543_v58 = vadd.f32 %v541_v54, %v532_v53  ;;  %1047 = vset.pattern.permute.xlu1 %v1121_v46  ;;  %1046 = vset.pattern.permute.xlu0 %v1121_v46  ;;  %v1122_v48 = vmov 1966171168  }
 0x29d   : > { %v714_v49 = vunpack.c.l.s4 %v1122_v48  ;;  %v1307_v50 = vshrl.u32 %v645_v47, 7 }
 0x29e   : > { %v555_v60 = vadd.f32 %v553_v56, %v544_v55  ;;  %v554_v63 = vadd.f32 %v552_v59, %v543_v58 }
 0x29f   : > { %v715_v52 = vunpack.c.0.s8 %v714_v49  ;;  %v647_v53 = vsub.s32 0, %v1307_v50  ;;  %v651_v54 = vsub.s32 1, %v1307_v50  ;;  %v655_v55 = vsub.s32 2, %v1307_v50 }
 0x2a0   : > { %v566_v1 = vadd.f32 %v564_v61, %v555_v60  ;;  %v565_v2 = vadd.f32 %v563_v0, %v554_v63  ;;  %v659_v56 = vsub.s32 3, %v1307_v50  ;;  %v663_v58 = vsub.s32 4, %v1307_v50 }
 0x2a1   : > { %v667_v59 = vsub.s32 5, %v1307_v50  ;;  %v671_v60 = vsub.s32 6, %v1307_v50  ;;  %v675_v61 = vsub.s32 7, %v1307_v50 }
 0x2a2   : > { %v573_v3 = vadd.f32 %v946_v62, %v566_v1  ;;  %v572_v4 = vadd.f32 %v946_v62, %v565_v2  ;;  %v1318_v1 = vsub.s32 %v715_v52, %v1307_v50 }
 0x2a4   : > { %vm575_vm4 = vcmp.ge.f32.partialorder %v573_v3, 0.0  ;;  %v577_v5 = vmul.f32 0.3, %v573_v3  ;;  %vm574_vm5 = vcmp.ge.f32.partialorder %v572_v4, 0.0  ;;  %v576_v6 = vmul.f32 0.3, %v572_v4 }
 0x2a6   : > { %v579_v7 = vsel %vm575_vm4, %v573_v3, %v577_v5  ;;  %v578_v9 = vsel %vm574_vm5, %v572_v4, %v576_v6 }
 0x2a7   : > { %v583_v8 = vsel %vm224_vm0, %v579_v7, 0.0  ;;  %v587_v10 = vmul.f32 %v579_v7, %v579_v7  ;;  %v580_v11 = vsel %vm224_vm0, %v578_v9, 0.0  ;;  %v586_v12 = vmul.f32 %v578_v9, %v578_v9 }
 0x2a8   : > { %584 = vadd.xlane.f32.xlu1 %v583_v8  ;;  %581 = vadd.xlane.f32.xlu0 %v580_v11 }
 0x2a9   : > { %v591_v13 = vsel %vm224_vm0, %v587_v10, 0.0  ;;  %v588_v14 = vsel %vm224_vm0, %v586_v12, 0.0 }
 0x2ac   : > { %592 = vadd.xlane.f32.xlu1 %v591_v13  ;;  %589 = vadd.xlane.f32.xlu0 %v588_v14 }
 0x335   : > { %v585_v15 = vpop.xlane.xlu1 %584  ;;  %v582_v17 = vpop.xlane.xlu0 %581 }
 0x336   : > { %v595_v16 = vmul.f32 0.03125, %v585_v15  ;;  %v594_v18 = vmul.f32 0.03125, %v582_v17 }
 0x338   : > { %v599_v20 = vmul.f32 %v595_v16, %v595_v16  ;;  %v598_v23 = vmul.f32 %v594_v18, %v594_v18  ;;  %v603_v29 = vsub.f32 %v579_v7, %v595_v16  ;;  %v602_v31 = vsub.f32 %v578_v9, %v594_v18 }
 0x339   : > { %v593_v19 = vpop.xlane.xlu1 %592  ;;  %v590_v22 = vpop.xlane.xlu0 %589 }
 0x33a   : > { %v597_v21 = vmul.f32 0.03125, %v593_v19  ;;  %v596_v24 = vmul.f32 0.03125, %v590_v22 }
 0x33c   : > { %v601_v25 = vsub.f32 %v597_v21, %v599_v20  ;;  %v600_v26 = vsub.f32 %v596_v24, %v598_v23 }
 0x33e   : > { %v605_v27 = vadd.f32 1e-05, %v601_v25  ;;  %v604_v28 = vadd.f32 1e-05, %v600_v26 }
 0x340   : > { %1052 = vrsqrt.f32 %v605_v27 }
 0x341   : > { %1054 = vrsqrt.f32 %v604_v28 }
 0x34a   : > { %v1053_v30 = vpop.eup %1052 }
 0x34b   : > { %v1055_v33 = vpop.eup %1054  ;;  %v609_v34 = vmul.f32 %v1053_v30, %v603_v29 }
 0x34c   : > { %v608_v36 = vmul.f32 %v1055_v33, %v602_v31 }
 0x34d   : > { %v616_v37 = vmul.f32 %v947_v32, %v609_v34 }
 0x34e   : > { %v615_v39 = vmul.f32 %v947_v32, %v608_v36 }
 0x34f   : > { %v623_v40 = vadd.f32 %v948_v35, %v616_v37 }
 0x350   : > { %v622_v41 = vadd.f32 %v948_v35, %v615_v39 }
 0x351   : > { %v630_v42 = vmul.f32 %v949_v38, %v623_v40 }
 0x352   : > { %v629_v43 = vmul.f32 %v949_v38, %v622_v41 }
 0x353   : > { %v634_v44 = vsel %vm224_vm0, %v630_v42, 0.0 }
 0x354   : > { %635 = vadd.xlane.f32.xlu1 %v634_v44  ;;  %v631_v45 = vsel %vm224_vm0, %v629_v43, 0.0  ;;  %v814_v44 = vand.u32 127, %v645_v47 }
 0x355   : > { %632 = vadd.xlane.f32.xlu0 %v631_v45 }
 0x356   : > { %v819_v45 = vadd.s32 4294967288, %v814_v44  ;;  %v817_v49 = vsub.s32 %v814_v44, %v1307_v50 }
 0x358   : > { %v822_v46 = vsub.s32 %v819_v45, %v1307_v50 }
 0x3e1   : > { %v636_v57 = vpop.xlane.xlu1 %635 }
 0x3e2   : > { %v640_v62 = vadd.f32 %v638_v51, %v636_v57  ;;  %v633_v63 = vpop.xlane.xlu0 %632 }
 0x3e3   : > { %v639_v0 = vadd.f32 %v638_v51, %v633_v63 }
 0x3e4   : > { %v680_v2 = vrot.slane %v640_v62, %v647_v53  ;;  %v684_v3 = vrot.slane %v640_v62, %v651_v54  ;;  %v688_v4 = vrot.slane %v640_v62, %v655_v55  ;;  %v692_v5 = vrot.slane %v640_v62, %v659_v56 }
 0x3e5   : > { %v696_v6 = vrot.slane %v640_v62, %v663_v58  ;;  %v700_v7 = vrot.slane %v640_v62, %v667_v59  ;;  %v704_v8 = vrot.slane %v640_v62, %v671_v60  ;;  %v708_v9 = vrot.slane %v640_v62, %v675_v61 }
 0x3e6   : > { %v758_v10 = vcombine.low %v680_v2, %v684_v3  ;;  %v759_v11 = vcombine.low %v688_v4, %v692_v5  ;;  %v648_v12 = vrot.slane %v639_v0, %v647_v53  ;;  %v652_v13 = vrot.slane %v639_v0, %v651_v54  ;;  %v641_v54 = vld [vmem:[%s209_s14] sm:$0x1] }
 0x3e7   : > { %v760_v14 = vcombine.low %v696_v6, %v700_v7  ;;  %v761_v15 = vcombine.low %v704_v8, %v708_v9  ;;  %v656_v16 = vrot.slane %v639_v0, %v655_v55  ;;  %v660_v17 = vrot.slane %v639_v0, %v659_v56 }
 0x3e8   : > { %v768_v18 = vrot.slane %v758_v10, %v1318_v1  ;;  %v775_v19 = vrot.slane %v759_v11, %v1318_v1  ;;  %v664_v20 = vrot.slane %v639_v0, %v663_v58  ;;  %v668_v21 = vrot.slane %v639_v0, %v667_v59 }
 0x3e9   : > { %v782_v22 = vrot.slane %v760_v14, %v1318_v1  ;;  %v789_v23 = vrot.slane %v761_v15, %v1318_v1  ;;  %v672_v24 = vrot.slane %v639_v0, %v671_v60  ;;  %v676_v25 = vrot.slane %v639_v0, %v675_v61 }
 0x3ea   : > { %v790_v26 = vcombine.low %v768_v18, %v775_v19  ;;  %v709_v27 = vcombine.low %v648_v12, %v652_v13  ;;  %v710_v28 = vcombine.low %v656_v16, %v660_v17  ;;  %v711_v29 = vcombine.low %v664_v20, %v668_v21 }
 0x3eb   : > { %v791_v30 = vcombine.low %v782_v22, %v789_v23  ;;  %v712_v31 = vcombine.low %v672_v24, %v676_v25  ;;  %vm642_vm7 = vcmp.ne.s32.totalorder %v641_v54, 0 }
 0x3ec   : > { %v798_v32 = vrot.slane %v790_v26, %v1318_v1  ;;  %v719_v33 = vrot.slane %v709_v27, %v1318_v1  ;;  %v726_v34 = vrot.slane %v710_v28, %v1318_v1  ;;  %v733_v35 = vrot.slane %v711_v29, %v1318_v1 }
 0x3ed   : > { %v805_v36 = vrot.slane %v791_v30, %v1318_v1  ;;  %v740_v37 = vrot.slane %v712_v31, %v1318_v1 }
 0x3ee   : > { %v741_v38 = vcombine.low %v719_v33, %v726_v34 }
 0x3ef   : > { %v806_v39 = vcombine.low %v798_v32, %v805_v36  ;;  %v742_v40 = vcombine.low %v733_v35, %v740_v37 }
 0x3f0   : > { %v749_v41 = vrot.slane %v741_v38, %v1318_v1 }
 0x3f1   : > { %811 = vperm.xlu1 %1047, %v806_v39   ;;  %v756_v42 = vrot.slane %v742_v40, %v1318_v1 }
 0x3f3   : > { %v757_v43 = vcombine.low %v749_v41, %v756_v42 }
 0x3f5   : > { %808 = vperm.xlu0 %1046, %v757_v43  }
 0x470   : > { %v812_v48 = vpop.permute.xlu1 %811 }
 0x471   : > { %v823_v51 = vrot.slane %v812_v48, %v822_v46 }
 0x474   : > { %v809_v52 = vpop.permute.xlu0 %808 }
 0x475   : > { %v818_v53 = vrot.slane %v809_v52, %v817_v49 }
 0x477   : > { %v825_v55 = vsel %vm824_vm6, %v823_v51, %v818_v53 }
 0x478   : > { %v832_v47 = vrot.slane %v825_v55, %v1318_v1 }
 0x47a   : > { %v839_v50 = vrot.slane %v832_v47, %v1318_v1 }
 0x47c   : > { %v841_v56 = vsel %vm642_vm7, 0.0, %v839_v50 }
 0x47d   : > { %843 = vst.msk [vmem:[%s201_s16] sm:$0x1] %vm842_vm8, %v841_v56 }
 0x47e   : > { %1069 = shalt.err (!%p1066_p3)
}
 0x47f   : > { %s1070_s6 = scalar_lea.hbm %s1345_s10, 16  ;;  %s1074_s9 = scalar_lea.hbm %s1391_s4, 32 }
 0x480   : > { %p1071_p4 = scmp.ne.s32.totalorder %s1345_s10, %s1070_s6  ;;  %p1075_p9 = scmp.lt.u32.totalorder %s1345_s10, %s1391_s4 }
 0x481   : > { %p1076_p10 = scmp.lt.u32.totalorder %s1074_s9, %s1070_s6  ;;  %p1078_p12 = scmp.lt.u32.totalorder %s1070_s6, %s1345_s10 }
 0x482   : > { %p1072_p7 = pnand %p1071_p4, %p1190_p5 }
 0x483   : > { %p1077_p11 = por %p1076_p10, %p1075_p9 }
 0x484   : > { %p1073_p8 = pneg %p1072_p7 }
 0x485   : > { %p1079_p13 = por %p1078_p12, %p1077_p11 }
 0x487   : > { %p1080_p0 = pnand %p1079_p13, %p1073_p8 }
 0x489   : > { %1083 = shalt.err (!%p1080_p0)
}
 0x48a   : > { %1004 = dma.vmem_to_hbm [thread:$0]  (%p1190_p5), %s1347_s21, 16, %s1345_s10, %s845_s28  }
 0x48b PF: > { %p1010_p1 = scmp.ge.s32.totalorder %s1118_s20, 2  ;;  %s869_s13 = sand.u32 1, %s1106_s17  }
 0x48c   : > { %s870_s14 = scalar_lea.sflag [#allocation5], %s869_s13 }
 0x48d   : > { %p1007_p2 = pnand %p1010_p1, %p1194_p6 }
 0x48f   : > { %1101 = dma.done.wait (!%p1007_p2), %s870_s14, 16  }
 0x490   : > { %1103 = vsyncadd (!%p1007_p2), %s870_s14, 4294967280  ;;  %p15_p3 = scmp.ge.s32.totalorder %s1177_s22, 4   ;;  %s1394_s17 = smov %s1110_s18 }
 0x491   : > { %s1395_s18 = smov %s1114_s19  ;;  %s1396_s19 = smov %s1188_s25 }
 0x492   : > { %s1397_s20 = smov %s1177_s22  ;;  %17 = sbr.rel (!%p15_p3) target bundleno = 5 (0x5), region = 74 }
 0x499   :  { %874 = vsyncpa [#allocation5], 1 }
 0x49a   :  { %876 = vsyncpa [#allocation5 + $0x1], 1 }

</bundles_post_ra>
